<compile_context>
chip_gen: v6e
topology: v6e:2x2x1
jax: 0.10.0
libtpu: 0.0.40
codegen_flags: <defaults>
</compile_context>

<pallas_src>
import jax
import jax.numpy as jnp
from jax.experimental import pallas as pl
from jax.experimental.pallas import tpu as pltpu


def _round_up(x, m):
    return ((x + m - 1) // m) * m


def _leaky_relu(x, slope=0.01):
    # torch.nn.LeakyReLU default negative_slope = 0.01; max form saves a select.
    return jnp.maximum(x, slope * x)


def _airl_fused_kernel(gamma_ref, s_ref, a_ref, ns_ref, d_ref, lp_ref,
                       w1s_ref, w1a_ref, w1ns_ref, b1_ref,
                       w2_ref, b2_ref, w3_ref, b3_ref,
                       out_ref):
    # gamma_ref : (1, 1) f32 in SMEM
    # s/a/ns    : (TILE_B, obs|act|obs) f32
    # d/lp      : (TILE_B, 1) f32
    # w*        : fused block-diagonal weights (compute dtype), b*: f32 biases
    cdt = w1s_ref.dtype
    s = s_ref[...].astype(cdt)
    a = a_ref[...].astype(cdt)
    ns = ns_ref[...].astype(cdt)

    pre1 = (jnp.dot(s, w1s_ref[...], preferred_element_type=jnp.float32)
            + jnp.dot(a, w1a_ref[...], preferred_element_type=jnp.float32)
            + jnp.dot(ns, w1ns_ref[...], preferred_element_type=jnp.float32)
            + b1_ref[...])
    h1 = _leaky_relu(pre1)
    h2 = _leaky_relu(
        jnp.dot(h1.astype(cdt), w2_ref[...],
                preferred_element_type=jnp.float32) + b2_ref[...])
    # y columns: [rw - vs | next_vs]
    y = jnp.dot(h2.astype(cdt), w3_ref[...],
                preferred_element_type=jnp.float32) + b3_ref[...]     # (TILE_B, 2)

    coef = gamma_ref[0, 0] * (1.0 - d_ref[...])                       # gamma*(1-done)
    out = y[:, 0:1] + coef * y[:, 1:2] - lp_ref[...]
    out_ref[...] = out.astype(out_ref.dtype)


def pack_fused_params(params, obs_size, action_size, compute_dtype=jnp.bfloat16):
    """One-time repack of the 12 per-layer tensors into fused block-diag weights.

    Fused hidden layout is [h_r | hv_s | hv_s'].  The first layer is split by
    input stream (states / actions / next_states) so the kernel never needs a
    concatenated input.  The last layer is folded to 2 columns:
        col0 = rw - vs,  col1 = next_vs.
    Biases stay f32; weights are cast to `compute_dtype` (default bf16).
    """
    H = params["rw1"].shape[1]
    H2 = params["rw2"].shape[1]

    w1_s = jnp.zeros((obs_size, 3 * H), jnp.float32)
    w1_s = w1_s.at[:, 0:H].set(params["rw1"][:obs_size])            # r([s, a]) - s part
    w1_s = w1_s.at[:, H:2 * H].set(params["vw1"])                   # v(s)
    w1_a = jnp.zeros((action_size, 3 * H), jnp.float32)
    w1_a = w1_a.at[:, 0:H].set(params["rw1"][obs_size:])            # r([s, a]) - a part
    w1_ns = jnp.zeros((obs_size, 3 * H), jnp.float32)
    w1_ns = w1_ns.at[:, 2 * H:3 * H].set(params["vw1"])             # v(s')
    b1 = jnp.concatenate([params["rb1"], params["vb1"], params["vb1"]], axis=1)

    w2 = jnp.zeros((3 * H, 3 * H2), jnp.float32)
    w2 = w2.at[0:H, 0:H2].set(params["rw2"])
    w2 = w2.at[H:2 * H, H2:2 * H2].set(params["vw2"])
    w2 = w2.at[2 * H:3 * H, 2 * H2:3 * H2].set(params["vw2"])
    b2 = jnp.concatenate([params["rb2"], params["vb2"], params["vb2"]], axis=1)

    w3 = jnp.zeros((3 * H2, 2), jnp.float32)
    w3 = w3.at[0:H2, 0:1].set(params["rw3"])                        # +rw
    w3 = w3.at[H2:2 * H2, 0:1].set(-params["vw3"])                  # -vs
    w3 = w3.at[2 * H2:3 * H2, 1:2].set(params["vw3"])               # +next_vs
    b3 = jnp.concatenate([params["rb3"] - params["vb3"], params["vb3"]], axis=1)

    return {
        "w1_s": w1_s.astype(compute_dtype),
        "w1_a": w1_a.astype(compute_dtype),
        "w1_ns": w1_ns.astype(compute_dtype),
        "b1": b1,
        "w2": w2.astype(compute_dtype), "b2": b2,
        "w3": w3.astype(compute_dtype), "b3": b3,
    }


def _choose_tile(batch, tile_b):
    b8 = _round_up(max(batch, 1), 8)
    tile = min(_round_up(tile_b, 8), b8)
    # Keep >=2 grid steps for large batches so the "parallel" batch axis can
    # shard across both TensorCores on multi-TC chips (v7x); small batches
    # collapse to a single step (step overhead dominates there).
    if b8 >= 1024 and tile >= b8:
        tile = _round_up((b8 + 1) // 2, 8)
    return max(tile, 8)


def _vmem_limit_bytes(tile, obs, act, fused_params):
    cdt_bytes = jnp.dtype(fused_params["w1_s"].dtype).itemsize
    h1_w = fused_params["w2"].shape[0]     # 3*H
    h2_w = fused_params["w2"].shape[1]     # 3*(H//2)
    stream = 2 * tile * (2 * obs + act + 3) * 4          # double-buffered row blocks
    weights = 2 * sum(int(v.size) * jnp.dtype(v.dtype).itemsize
                      for v in fused_params.values())
    inter = tile * ((h1_w + h2_w) * (4 + cdt_bytes) + (2 * obs + act) * cdt_bytes)
    est = stream + weights + inter
    # Never go below the usual scoped default; cap so it stays safe on v7x
    # (64 MiB physical VMEM per TensorCore).
    return int(min(max(2 * est, 32 * 1024 * 1024), 48 * 1024 * 1024))


def airl_discrim_forward(states, actions, dones, log_pis, next_states,
                         fused_params, gamma, *, tile_b=4096):
    """AIRLDiscrim.forward: f(s, a, d, s') - log_pi, tiled over the batch."""
    B, obs = states.shape
    act = actions.shape[1]

    states = states.astype(jnp.float32)
    actions = actions.astype(jnp.float32)
    next_states = next_states.astype(jnp.float32)
    dones = dones.reshape(B, 1).astype(jnp.float32)
    log_pis = log_pis.reshape(B, 1).astype(jnp.float32)
    gamma_arr = jnp.full((1, 1), gamma, jnp.float32)     # data, not a constant

    tile = _choose_tile(B, tile_b)
    b_pad = _round_up(B, tile)
    if b_pad != B:
        pad = ((0, b_pad - B), (0, 0))
        states = jnp.pad(states, pad)
        actions = jnp.pad(actions, pad)
        next_states = jnp.pad(next_states, pad)
        dones = jnp.pad(dones, pad)
        log_pis = jnp.pad(log_pis, pad)
    grid = (b_pad // tile,)

    w1_s, w1_a, w1_ns = (fused_params["w1_s"], fused_params["w1_a"],
                         fused_params["w1_ns"])
    b1 = fused_params["b1"]
    w2, b2 = fused_params["w2"], fused_params["b2"]
    w3, b3 = fused_params["w3"], fused_params["b3"]

    def batch_spec(feat):
        return pl.BlockSpec((tile, feat), lambda i: (i, 0))

    def const_spec(shape):
        return pl.BlockSpec(shape, lambda i: (0, 0))

    flops = 2 * b_pad * (w1_s.shape[0] * w1_s.shape[1]
                         + w1_a.shape[0] * w1_a.shape[1]
                         + w1_ns.shape[0] * w1_ns.shape[1]
                         + w2.shape[0] * w2.shape[1]
                         + w3.shape[0] * w3.shape[1])
    weight_bytes = sum(int(v.size) * jnp.dtype(v.dtype).itemsize
                       for v in fused_params.values())
    bytes_accessed = b_pad * (2 * obs + act + 3) * 4 + weight_bytes
    cost = pl.CostEstimate(flops=int(flops), transcendentals=0,
                           bytes_accessed=int(bytes_accessed))

    out = pl.pallas_call(
        _airl_fused_kernel,
        out_shape=jax.ShapeDtypeStruct((b_pad, 1), jnp.float32),
        grid=grid,
        in_specs=[
            pl.BlockSpec(memory_space=pltpu.MemorySpace.SMEM),   # gamma (1,1)
            batch_spec(obs),                                     # states
            batch_spec(act),                                     # actions
            batch_spec(obs),                                     # next_states
            batch_spec(1),                                       # dones
            batch_spec(1),                                       # log_pis
            const_spec(w1_s.shape), const_spec(w1_a.shape), const_spec(w1_ns.shape),
            const_spec(b1.shape),
            const_spec(w2.shape), const_spec(b2.shape),
            const_spec(w3.shape), const_spec(b3.shape),
        ],
        out_specs=batch_spec(1),
        compiler_params=pltpu.CompilerParams(
            dimension_semantics=("parallel",),
            vmem_limit_bytes=_vmem_limit_bytes(tile, obs, act, fused_params)),
        cost_estimate=cost,
    )(gamma_arr, states, actions, next_states, dones, log_pis,
      w1_s, w1_a, w1_ns, b1, w2, b2, w3, b3)
    return out[:B]


def init_params(key, obs_size, action_size, hidden_dim=64, std=0.01):
    """Deterministic init matching nn.init.normal_(std=0.01) / zeros_ biases."""
    h2 = hidden_dim // 2
    shapes = {
        "rw1": (obs_size + action_size, hidden_dim),
        "rw2": (hidden_dim, h2),
        "rw3": (h2, 1),
        "vw1": (obs_size, hidden_dim),
        "vw2": (hidden_dim, h2),
        "vw3": (h2, 1),
    }
    params = {}
    keys = jax.random.split(key, len(shapes))
    for k, (name, shape) in zip(keys, sorted(shapes.items())):
        params[name] = std * jax.random.normal(k, shape, dtype=jnp.float32)
    params["rb1"] = jnp.zeros((1, hidden_dim), jnp.float32)
    params["rb2"] = jnp.zeros((1, h2), jnp.float32)
    params["rb3"] = jnp.zeros((1, 1), jnp.float32)
    params["vb1"] = jnp.zeros((1, hidden_dim), jnp.float32)
    params["vb2"] = jnp.zeros((1, h2), jnp.float32)
    params["vb3"] = jnp.zeros((1, 1), jnp.float32)
    return params


def airl_discrim_forward_ref(states, actions, dones, log_pis, next_states,
                             params, gamma):
    """Pure-JAX f32 reference mirroring the PyTorch forward."""
    def leaky(x):
        return jnp.where(x > 0, x, 0.01 * x)

    sa = jnp.concatenate([states, actions], axis=1)
    h = leaky(sa @ params["rw1"] + params["rb1"])
    h = leaky(h @ params["rw2"] + params["rb2"])
    rw = h @ params["rw3"] + params["rb3"]

    def v_net(x):
        hv = leaky(x @ params["vw1"] + params["vb1"])
        hv = leaky(hv @ params["vw2"] + params["vb2"])
        return hv @ params["vw3"] + params["vb3"]

    return rw + gamma * (1.0 - dones) * v_net(next_states) - v_net(states) - log_pis


def _make_inputs(key, B, obs_size, action_size):
    k_s, k_a, k_d, k_lp, k_ns = jax.random.split(key, 5)
    states = jax.random.normal(k_s, (B, obs_size), dtype=jnp.float32)
    actions = jax.random.normal(k_a, (B, action_size), dtype=jnp.float32)
    dones = (jax.random.uniform(k_d, (B, 1)) < 0.2).astype(jnp.float32)
    log_pis = -jax.random.uniform(k_lp, (B, 1), dtype=jnp.float32)
    next_states = jax.random.normal(k_ns, (B, obs_size), dtype=jnp.float32)
    return states, actions, dones, log_pis, next_states


if __name__ == "__main__":
    obs_size = 16
    action_size = 8
    hidden_dim = 64
    gamma = 0.99

    key = jax.random.PRNGKey(0)
    k_param, k_in1, k_in2 = jax.random.split(key, 3)

    params = init_params(k_param, obs_size, action_size, hidden_dim)
    fused_bf16 = pack_fused_params(params, obs_size, action_size)

    # Small case: single grid step.
    B = 8
    s, a, d, lp, ns = _make_inputs(k_in1, B, obs_size, action_size)
    out = jax.block_until_ready(
        airl_discrim_forward(s, a, d, lp, ns, fused_bf16, gamma))
    ref = airl_discrim_forward_ref(s, a, d, lp, ns, params, gamma)
    assert out.shape == (B, 1)
    assert jnp.allclose(out, ref, atol=1e-4, rtol=1e-4), (out, ref)

    # Ragged case: exercises the batch grid (>1 step) and padding.
    B2 = 300
    s2, a2, d2, lp2, ns2 = _make_inputs(k_in2, B2, obs_size, action_size)
    out2 = jax.block_until_ready(
        airl_discrim_forward(s2, a2, d2, lp2, ns2, fused_bf16, gamma, tile_b=128))
    ref2 = airl_discrim_forward_ref(s2, a2, d2, lp2, ns2, params, gamma)
    assert out2.shape == (B2, 1)
    assert jnp.allclose(out2, ref2, atol=1e-4, rtol=1e-4), (out2, ref2)

    # Optional full-f32 compute path (addresses bf16 accuracy concern for
    # trained / large-magnitude weights).
    fused_f32 = pack_fused_params(params, obs_size, action_size,
                                  compute_dtype=jnp.float32)
    out3 = jax.block_until_ready(
        airl_discrim_forward(s2, a2, d2, lp2, ns2, fused_f32, gamma, tile_b=128))
    assert jnp.allclose(out3, ref2, atol=1e-4, rtol=1e-4), (out3, ref2)

    print("KERNEL_OK")
</pallas_src>

<mosaic_0001>
module attributes {stable_mosaic.version = 11 : i64} {
  func.func @_airl_fused_kernel(%arg0: i32, %arg1: memref<1x1xf32, #tpu.memory_space<smem>>, %arg2: memref<8x16xf32, #tpu.memory_space<vmem>>, %arg3: memref<8x8xf32, #tpu.memory_space<vmem>>, %arg4: memref<8x16xf32, #tpu.memory_space<vmem>>, %arg5: memref<8x1xf32, #tpu.memory_space<vmem>>, %arg6: memref<8x1xf32, #tpu.memory_space<vmem>>, %arg7: memref<16x192xbf16, #tpu.memory_space<vmem>>, %arg8: memref<8x192xbf16, #tpu.memory_space<vmem>>, %arg9: memref<16x192xbf16, #tpu.memory_space<vmem>>, %arg10: memref<1x192xf32, #tpu.memory_space<vmem>>, %arg11: memref<192x96xbf16, #tpu.memory_space<vmem>>, %arg12: memref<1x96xf32, #tpu.memory_space<vmem>>, %arg13: memref<96x2xbf16, #tpu.memory_space<vmem>>, %arg14: memref<1x2xf32, #tpu.memory_space<vmem>>, %arg15: memref<8x1xf32, #tpu.memory_space<vmem>>) attributes {dimension_semantics = [#tpu.dimension_semantics<parallel>], iteration_bounds = array<i64: 1>, scalar_prefetch = 0 : i64, scratch_operands = 0 : i64, tpu.core_type = #tpu.core_type<tc>, window_params = [{transform_indices = @transform_0, window_bounds = array<i64: 1, 1>}, {transform_indices = @transform_1, window_bounds = array<i64: 8, 16>}, {transform_indices = @transform_2, window_bounds = array<i64: 8, 8>}, {transform_indices = @transform_3, window_bounds = array<i64: 8, 16>}, {transform_indices = @transform_4, window_bounds = array<i64: 8, 1>}, {transform_indices = @transform_5, window_bounds = array<i64: 8, 1>}, {pipeline_mode = #tpu.pipeline_mode<synchronous>, transform_indices = @transform_6, window_bounds = array<i64: 16, 192>}, {pipeline_mode = #tpu.pipeline_mode<synchronous>, transform_indices = @transform_7, window_bounds = array<i64: 8, 192>}, {pipeline_mode = #tpu.pipeline_mode<synchronous>, transform_indices = @transform_8, window_bounds = array<i64: 16, 192>}, {pipeline_mode = #tpu.pipeline_mode<synchronous>, transform_indices = @transform_9, window_bounds = array<i64: 1, 192>}, {pipeline_mode = #tpu.pipeline_mode<synchronous>, transform_indices = @transform_10, window_bounds = array<i64: 192, 96>}, {pipeline_mode = #tpu.pipeline_mode<synchronous>, transform_indices = @transform_11, window_bounds = array<i64: 1, 96>}, {pipeline_mode = #tpu.pipeline_mode<synchronous>, transform_indices = @transform_12, window_bounds = array<i64: 96, 2>}, {pipeline_mode = #tpu.pipeline_mode<synchronous>, transform_indices = @transform_13, window_bounds = array<i64: 1, 2>}, {transform_indices = @transform_14, window_bounds = array<i64: 8, 1>}]} {
    %c0 = arith.constant 0 : index
    %c0_0 = arith.constant 0 : index
    %0 = vector.load %arg2[%c0, %c0_0] : memref<8x16xf32, #tpu.memory_space<vmem>>, vector<8x16xf32>
    %1 = arith.truncf %0 : vector<8x16xf32> to vector<8x16xbf16>
    %c0_1 = arith.constant 0 : index
    %c0_2 = arith.constant 0 : index
    %2 = vector.load %arg3[%c0_1, %c0_2] : memref<8x8xf32, #tpu.memory_space<vmem>>, vector<8x8xf32>
    %3 = arith.truncf %2 : vector<8x8xf32> to vector<8x8xbf16>
    %c0_3 = arith.constant 0 : index
    %c0_4 = arith.constant 0 : index
    %4 = vector.load %arg4[%c0_3, %c0_4] : memref<8x16xf32, #tpu.memory_space<vmem>>, vector<8x16xf32>
    %5 = arith.truncf %4 : vector<8x16xf32> to vector<8x16xbf16>
    %c0_5 = arith.constant 0 : index
    %c0_6 = arith.constant 0 : index
    %6 = vector.load %arg7[%c0_5, %c0_6] : memref<16x192xbf16, #tpu.memory_space<vmem>>, vector<16x192xbf16>
    %cst = arith.constant dense<0.000000e+00> : vector<8x192xf32>
    %7 = tpu.matmul %1, %6, %cst {dimension_numbers = #tpu.dot_dimension_numbers<[1], [0], [0], [1], [0, 0, 1, 1], [], []>} : vector<8x16xbf16>, vector<16x192xbf16>, vector<8x192xf32> -> vector<8x192xf32>
    %c0_7 = arith.constant 0 : index
    %c0_8 = arith.constant 0 : index
    %8 = vector.load %arg8[%c0_7, %c0_8] : memref<8x192xbf16, #tpu.memory_space<vmem>>, vector<8x192xbf16>
    %cst_9 = arith.constant dense<0.000000e+00> : vector<8x192xf32>
    %9 = tpu.matmul %3, %8, %cst_9 {dimension_numbers = #tpu.dot_dimension_numbers<[1], [0], [0], [1], [0, 0, 1, 1], [], []>} : vector<8x8xbf16>, vector<8x192xbf16>, vector<8x192xf32> -> vector<8x192xf32>
    %10 = arith.addf %7, %9 : vector<8x192xf32>
    %c0_10 = arith.constant 0 : index
    %c0_11 = arith.constant 0 : index
    %11 = vector.load %arg9[%c0_10, %c0_11] : memref<16x192xbf16, #tpu.memory_space<vmem>>, vector<16x192xbf16>
    %cst_12 = arith.constant dense<0.000000e+00> : vector<8x192xf32>
    %12 = tpu.matmul %5, %11, %cst_12 {dimension_numbers = #tpu.dot_dimension_numbers<[1], [0], [0], [1], [0, 0, 1, 1], [], []>} : vector<8x16xbf16>, vector<16x192xbf16>, vector<8x192xf32> -> vector<8x192xf32>
    %13 = arith.addf %10, %12 : vector<8x192xf32>
    %c0_13 = arith.constant 0 : index
    %c0_14 = arith.constant 0 : index
    %14 = vector.load %arg10[%c0_13, %c0_14] : memref<1x192xf32, #tpu.memory_space<vmem>>, vector<1x192xf32>
    %15 = vector.broadcast %14 : vector<1x192xf32> to vector<8x192xf32>
    %16 = arith.addf %13, %15 : vector<8x192xf32>
    %cst_15 = arith.constant 0.00999999977 : f32
    %17 = vector.broadcast %cst_15 : f32 to vector<8x192xf32>
    %18 = arith.mulf %17, %16 : vector<8x192xf32>
    %19 = arith.maximumf %16, %18 : vector<8x192xf32>
    %20 = arith.truncf %19 : vector<8x192xf32> to vector<8x192xbf16>
    %c0_16 = arith.constant 0 : index
    %c0_17 = arith.constant 0 : index
    %21 = vector.load %arg11[%c0_16, %c0_17] : memref<192x96xbf16, #tpu.memory_space<vmem>>, vector<192x96xbf16>
    %cst_18 = arith.constant dense<0.000000e+00> : vector<8x96xf32>
    %22 = tpu.matmul %20, %21, %cst_18 {dimension_numbers = #tpu.dot_dimension_numbers<[1], [0], [0], [1], [0, 0, 1, 1], [], []>} : vector<8x192xbf16>, vector<192x96xbf16>, vector<8x96xf32> -> vector<8x96xf32>
    %c0_19 = arith.constant 0 : index
    %c0_20 = arith.constant 0 : index
    %23 = vector.load %arg12[%c0_19, %c0_20] : memref<1x96xf32, #tpu.memory_space<vmem>>, vector<1x96xf32>
    %24 = vector.broadcast %23 : vector<1x96xf32> to vector<8x96xf32>
    %25 = arith.addf %22, %24 : vector<8x96xf32>
    %cst_21 = arith.constant 0.00999999977 : f32
    %26 = vector.broadcast %cst_21 : f32 to vector<8x96xf32>
    %27 = arith.mulf %26, %25 : vector<8x96xf32>
    %28 = arith.maximumf %25, %27 : vector<8x96xf32>
    %29 = arith.truncf %28 : vector<8x96xf32> to vector<8x96xbf16>
    %c0_22 = arith.constant 0 : index
    %c0_23 = arith.constant 0 : index
    %30 = vector.load %arg13[%c0_22, %c0_23] : memref<96x2xbf16, #tpu.memory_space<vmem>>, vector<96x2xbf16>
    %cst_24 = arith.constant dense<0.000000e+00> : vector<8x2xf32>
    %31 = tpu.matmul %29, %30, %cst_24 {dimension_numbers = #tpu.dot_dimension_numbers<[1], [0], [0], [1], [0, 0, 1, 1], [], []>} : vector<8x96xbf16>, vector<96x2xbf16>, vector<8x2xf32> -> vector<8x2xf32>
    %c0_25 = arith.constant 0 : index
    %c0_26 = arith.constant 0 : index
    %32 = vector.load %arg14[%c0_25, %c0_26] : memref<1x2xf32, #tpu.memory_space<vmem>>, vector<1x2xf32>
    %33 = vector.broadcast %32 : vector<1x2xf32> to vector<8x2xf32>
    %34 = arith.addf %31, %33 : vector<8x2xf32>
    %c0_27 = arith.constant 0 : index
    %c0_28 = arith.constant 0 : index
    %35 = memref.load %arg1[%c0_27, %c0_28] : memref<1x1xf32, #tpu.memory_space<smem>>
    %c0_29 = arith.constant 0 : index
    %c0_30 = arith.constant 0 : index
    %36 = vector.load %arg5[%c0_29, %c0_30] : memref<8x1xf32, #tpu.memory_space<vmem>>, vector<8x1xf32>
    %cst_31 = arith.constant 1.000000e+00 : f32
    %37 = vector.broadcast %cst_31 : f32 to vector<8x1xf32>
    %38 = arith.subf %37, %36 : vector<8x1xf32>
    %39 = vector.broadcast %35 : f32 to vector<8x1xf32>
    %40 = arith.mulf %39, %38 : vector<8x1xf32>
    %41 = vector.extract_strided_slice %34 {offsets = [0, 0], sizes = [8, 1], strides = [1, 1]} : vector<8x2xf32> to vector<8x1xf32>
    %42 = vector.extract_strided_slice %34 {offsets = [0, 1], sizes = [8, 1], strides = [1, 1]} : vector<8x2xf32> to vector<8x1xf32>
    %43 = arith.mulf %40, %42 : vector<8x1xf32>
    %44 = arith.addf %41, %43 : vector<8x1xf32>
    %c0_32 = arith.constant 0 : index
    %c0_33 = arith.constant 0 : index
    %45 = vector.load %arg6[%c0_32, %c0_33] : memref<8x1xf32, #tpu.memory_space<vmem>>, vector<8x1xf32>
    %46 = arith.subf %44, %45 : vector<8x1xf32>
    %c0_34 = arith.constant 0 : index
    %c0_35 = arith.constant 0 : index
    %47 = vector.load %arg15[%c0_34, %c0_35] : memref<8x1xf32, #tpu.memory_space<vmem>>, vector<8x1xf32>
    tpu.vector_store %arg15[%c0_34, %c0_35], %46 {strides = array<i32>} : memref<8x1xf32, #tpu.memory_space<vmem>>, vector<8x1xf32>,
    return
  }
  func.func @transform_0(%arg0: i32) -> (i32, i32) {
    %c0_i32 = arith.constant 0 : i32
    %c0_i32_0 = arith.constant 0 : i32
    %c0_i32_1 = arith.constant 0 : i32
    return %c0_i32, %c0_i32_0 : i32, i32
  }
  func.func @transform_1(%arg0: i32) -> (i32, i32) {
    %c0_i32 = arith.constant 0 : i32
    %c0_i32_0 = arith.constant 0 : i32
    return %arg0, %c0_i32 : i32, i32
  }
  func.func @transform_2(%arg0: i32) -> (i32, i32) {
    %c0_i32 = arith.constant 0 : i32
    %c0_i32_0 = arith.constant 0 : i32
    return %arg0, %c0_i32 : i32, i32
  }
  func.func @transform_3(%arg0: i32) -> (i32, i32) {
    %c0_i32 = arith.constant 0 : i32
    %c0_i32_0 = arith.constant 0 : i32
    return %arg0, %c0_i32 : i32, i32
  }
  func.func @transform_4(%arg0: i32) -> (i32, i32) {
    %c0_i32 = arith.constant 0 : i32
    %c0_i32_0 = arith.constant 0 : i32
    return %arg0, %c0_i32 : i32, i32
  }
  func.func @transform_5(%arg0: i32) -> (i32, i32) {
    %c0_i32 = arith.constant 0 : i32
    %c0_i32_0 = arith.constant 0 : i32
    return %arg0, %c0_i32 : i32, i32
  }
  func.func @transform_6(%arg0: i32) -> (i32, i32) {
    %c0_i32 = arith.constant 0 : i32
    %c0_i32_0 = arith.constant 0 : i32
    %c0_i32_1 = arith.constant 0 : i32
    return %c0_i32, %c0_i32_0 : i32, i32
  }
  func.func @transform_7(%arg0: i32) -> (i32, i32) {
    %c0_i32 = arith.constant 0 : i32
    %c0_i32_0 = arith.constant 0 : i32
    %c0_i32_1 = arith.constant 0 : i32
    return %c0_i32, %c0_i32_0 : i32, i32
  }
  func.func @transform_8(%arg0: i32) -> (i32, i32) {
    %c0_i32 = arith.constant 0 : i32
    %c0_i32_0 = arith.constant 0 : i32
    %c0_i32_1 = arith.constant 0 : i32
    return %c0_i32, %c0_i32_0 : i32, i32
  }
  func.func @transform_9(%arg0: i32) -> (i32, i32) {
    %c0_i32 = arith.constant 0 : i32
    %c0_i32_0 = arith.constant 0 : i32
    %c0_i32_1 = arith.constant 0 : i32
    return %c0_i32, %c0_i32_0 : i32, i32
  }
  func.func @transform_10(%arg0: i32) -> (i32, i32) {
    %c0_i32 = arith.constant 0 : i32
    %c0_i32_0 = arith.constant 0 : i32
    %c0_i32_1 = arith.constant 0 : i32
    return %c0_i32, %c0_i32_0 : i32, i32
  }
  func.func @transform_11(%arg0: i32) -> (i32, i32) {
    %c0_i32 = arith.constant 0 : i32
    %c0_i32_0 = arith.constant 0 : i32
    %c0_i32_1 = arith.constant 0 : i32
    return %c0_i32, %c0_i32_0 : i32, i32
  }
  func.func @transform_12(%arg0: i32) -> (i32, i32) {
    %c0_i32 = arith.constant 0 : i32
    %c0_i32_0 = arith.constant 0 : i32
    %c0_i32_1 = arith.constant 0 : i32
    return %c0_i32, %c0_i32_0 : i32, i32
  }
  func.func @transform_13(%arg0: i32) -> (i32, i32) {
    %c0_i32 = arith.constant 0 : i32
    %c0_i32_0 = arith.constant 0 : i32
    %c0_i32_1 = arith.constant 0 : i32
    return %c0_i32, %c0_i32_0 : i32, i32
  }
  func.func @transform_14(%arg0: i32) -> (i32, i32) {
    %c0_i32 = arith.constant 0 : i32
    %c0_i32_0 = arith.constant 0 : i32
    return %arg0, %c0_i32 : i32, i32
  }
}

</mosaic_0001>

<bundles_post_ra>
// kernel: tpu_custom_call.1
= control target key start
LH: loop header
LB: loop body
LE: loop exit
PB: predicated region body
PF: predicated region fallthrough
CT: control target
= control target key end

     0   :  { %20 = vsyncpa [#allocation4], 0  ;;  %s641_s29 = smov [#allocation3]   ;;  %s806_s0 = inlined_call_operand.<no memory space> [shape: f32[1,1], index: 0, kind: input, shape index: {}]   ;;  %s807_s1 = inlined_call_operand.vmem [shape: f32[8,16], index: 1, kind: input, shape index: {}]   ;;  %s808_s2 = inlined_call_operand.vmem [shape: f32[8,8], index: 2, kind: input, shape index: {}]   ;;  %s809_s3 = inlined_call_operand.vmem [shape: f32[8,16], index: 3, kind: input, shape index: {}]   ;;  %s810_s4 = inlined_call_operand.vmem [shape: f32[8,1], index: 4, kind: input, shape index: {}]   ;;  %s811_s5 = inlined_call_operand.vmem [shape: f32[8,1], index: 5, kind: input, shape index: {}]   ;;  %s812_s6 = inlined_call_operand.vmem [shape: bf16[16,192], index: 6, kind: input, shape index: {}]   ;;  %s813_s7 = inlined_call_operand.vmem [shape: bf16[8,192], index: 7, kind: input, shape index: {}]   ;;  %s814_s8 = inlined_call_operand.vmem [shape: bf16[16,192], index: 8, kind: input, shape index: {}]   ;;  %s815_s9 = inlined_call_operand.vmem [shape: f32[1,192], index: 9, kind: input, shape index: {}]   ;;  %s816_s10 = inlined_call_operand.hbm [shape: bf16[192,96], index: 10, kind: input, shape index: {}]   ;;  %s817_s11 = inlined_call_operand.vmem [shape: f32[1,96], index: 11, kind: input, shape index: {}]   ;;  %s818_s12 = inlined_call_operand.vmem [shape: bf16[96,2], index: 12, kind: input, shape index: {}]   ;;  %s819_s13 = inlined_call_operand.vmem [shape: f32[1,2], index: 13, kind: input, shape index: {}]   ;;  %s820_s14 = inlined_call_operand.vmem [shape: f32[8,1], index: 14, kind: output, shape index: {}]  }
   0x1   :  { %s46_s30 = sshll.u32 %s641_s29, 4  ;;  %s47_s30 = int_to_ptr.vmem [resolvable:$true] %s46_s30 }
   0x2   :  { %s627_s15 = scalar_lea.vmem %s47_s30, 1536  ;;  %p632_p1 = scmp.lt.s32.totalorder %s47_s30, %s47_s30 }
   0x3   :  { %p628_p0 = scmp.ne.s32.totalorder %s47_s30, %s627_s15  ;;  %p633_p2 = scmp.lt.s32.totalorder %s627_s15, %s627_s15 }
   0x5   :  { %p634_p3 = por %p633_p2, %p632_p1 }
   0x7   :  { %p635_p4 = pnand %p634_p3, %p628_p0 }
   0x9   :  { %638 = shalt.err (!%p635_p4)
}
   0xa   :  { %s642_s16 = smov 64   ;;  %s643_s17 = smov 4  }
   0xb   :  { %52 = dma.hbm_to_vmem [thread:$0]  %s816_s10, 1536, %s47_s30, [#allocation4], %s642_s16, %s642_s16, %s643_s17  }
   0xc   :  { %639 = dma.done.wait [#allocation4], 1536  }
   0xd   :  { %640 = vsyncadd [#allocation4], 4294965760  ;;  %v644_v0 = vmov 0   ;;  %v71_v1 = vld [vmem:[%s813_s7] sm:$0xff]  ;;  %vm81_vm0 = vcmask 1043456   ;;  %vm77_vm1 = vcmask 64512   ;;  %v244_v34 = vlaneseq }
   0xe   :  { %120 = vmatprep.mubr.bf16.mxu0 %v644_v0  ;;  %369 = vmatprep.subr.bf16.mxu1 %v644_v0  ;;  %v65_v2 = vld [vmem:[%s808_s2] sm:$0xff]  ;;  %v532_v3 = vcombine.high %v71_v1, %v71_v1  ;;  %v531_v4 = vcombine.low %v71_v1, %v71_v1  ;;  %v601_v9 = vld [vmem:[#allocation3 + $0x38] sm:$0xff]   ;;  %v602_v11 = vld [vmem:[#allocation3 + $0x30] sm:$0xff]   ;;  %vm139_vm2 = vcmask 130048   ;;  %v645_v28 = vmov 0.0  }
   0xf   :  { %v597_v5 = vld [vmem:[%s812_s6 + $0x4] ss:$8 sps:$4 sm:$0xff]   ;;  %v66_v7 = vpack.c.bf16 %v65_v2, %v65_v2  ;;  %v595_v8 = vld [vmem:[%s812_s6] ss:$8 sps:$4 sm:$0xff]   ;;  %370 = vmatpush1.bf16.msra.mxu1 %v601_v9  ;;  %v605_v18 = vld [vmem:[#allocation3 + $0x18] sm:$0xff]   ;;  %v245_v37 = vshrl.u32 %v244_v34, 7 }
  0x10   :  { %533 = vmatprep.subr.msk.bf16.mxu0 %vm81_vm0, %v532_v3  ;;  %v83_v6 = vsel %vm81_vm0, %v531_v4, 0  ;;  %v600_v10 = vld [vmem:[%s814_s8 + $0x4] ss:$8 sps:$4 sm:$0xff]   ;;  %371 = vmatprep.subr.bf16.mxu1 %v644_v0  ;;  %v598_v14 = vld [vmem:[%s814_s8] ss:$8 sps:$4 sm:$0xff]   ;;  %v606_v20 = vld [vmem:[#allocation3 + $0x10] sm:$0xff]  }
  0x11   :  { %103 = vmatpush1.bf16.msra.mxu0 %v83_v6  ;;  %v63_v12 = vld [vmem:[%s807_s1] sm:$0xff]  ;;  %v603_v13 = vld [vmem:[#allocation3 + $0x28] sm:$0xff]   ;;  %v609_v23 = vld [vmem:[#allocation3 + $0x58] sm:$0xff]   ;;  %v246_v40 = vsub.s32 0, %v245_v37  ;;  %v250_v43 = vsub.s32 1, %v245_v37  ;;  %vm365_vm3 = vcmask 523264  }
  0x12   :  { %157 = vmatprep.subr.bf16.mxu0 %v597_v5  ;;  %v64_v15 = vpack.c.bf16 %v63_v12, %v63_v12  ;;  %v604_v16 = vld [vmem:[#allocation3 + $0x20] sm:$0xff]   ;;  %v607_v21 = vld [vmem:[#allocation3 + $0x8] sm:$0xff]   ;;  %v610_v24 = vld [vmem:[#allocation3 + $0x50] sm:$0xff]   ;;  %vm646_vm4 = vmmov 0   ;;  %vm467_vm5 = vcmask 785408   ;;  %vm524_vm6 = vcmask 7168  }
  0x13   :  { %372 = vmatpush1.bf16.msra.mxu1 %v602_v11  ;;  %v67_v17 = vld [vmem:[%s809_s3] sm:$0xff]  ;;  %v611_v25 = vld [vmem:[#allocation3 + $0x48] sm:$0xff]   ;;  %v615_v30 = vld [vmem:[%s818_s12 + $0x18] sm:$0xff]  }
  0x14   :  { %534 = vmatmul.mubr.msk.bf16.vlgmr.msra.gmra.mxu0 %vm77_vm1, %v66_v7  ;;  %373 = vmatprep.subr.bf16.mxu1 %v644_v0  ;;  %v68_v19 = vpack.c.bf16 %v67_v17, %v67_v17  ;;  %v608_v22 = vld [vmem:[#allocation3] sm:$0xff]   ;;  %v613_v27 = vld [vmem:[%s818_s12 + $0x28] sm:$0xff]   ;;  %v616_v31 = vld [vmem:[%s818_s12 + $0x10] sm:$0xff]  }
  0x15   :  { %158 = vmatpush1.bf16.msra.mxu0 %v595_v8  ;;  %175 = vmatprep.mubr.bf16.mxu0 %v644_v0  ;;  %v612_v26 = vld [vmem:[#allocation3 + $0x40] sm:$0xff]   ;;  %v617_v63 = vld [vmem:[%s818_s12 + $0x8] sm:$0xff]  }
  0x16   :  { %213 = vmatprep.subr.bf16.mxu0 %v600_v10  ;;  %v614_v29 = vld [vmem:[%s818_s12 + $0x20] sm:$0xff]  }
  0x17   :  { %374 = vmatpush1.bf16.msra.mxu1 %v603_v13  ;;  %v242_v42 = vld [vmem:[%s815_s9] sm:$0x3] }
  0x18   :  { %375 = vmatprep.subr.bf16.mxu1 %v644_v0  ;;  %v247_v46 = vrot.slane %v242_v42, %v246_v40  ;;  %v251_v50 = vrot.slane %v242_v42, %v250_v43  ;;  %v541_v1 = vld [vmem:[%s817_s11] ss:$0 sm:$0xff] }
  0x19   :  { %v555_v10 = vld [vmem:[%s819_s13] ss:$0 sm:$0xff] }
  0x1b   :  { %376 = vmatpush1.bf16.msra.mxu1 %v604_v16  ;;  %v512_v16 = vld [vmem:[%s810_s4] sm:$0xff] }
  0x1c   :  { %537 = vmatmul.mubr.msk.bf16.vlgmr.msra.gmra.mxu0 %vm139_vm2, %v64_v15  ;;  %377 = vmatprep.subr.bf16.mxu1 %v644_v0  ;;  %v513_v17 = vsub.f32 1.0, %v512_v16 }
  0x1d   :  { %214 = vmatpush1.bf16.msra.mxu0 %v598_v14  ;;  %231 = vmatprep.mubr.bf16.mxu0 %v644_v0 }
  0x1e   :  { %570 = vmatprep.subr.bf16.mxu0 %v645_v28 }
  0x1f   :  { %378 = vmatpush1.bf16.msra.mxu1 %v605_v18  ;;  %v514_v18 = vstv %s806_s0 }
  0x20   :  { %379 = vmatprep.subr.bf16.mxu1 %v644_v0 }
  0x23   :  { %380 = vmatpush1.bf16.msra.mxu1 %v606_v20 }
  0x24   :  { %540 = vmatmul.mubr.msk.bf16.vlgmr.msra.gmra.mxu0 %vm139_vm2, %v68_v19  ;;  %381 = vmatprep.subr.bf16.mxu1 %v644_v0  ;;  %v515_v19 = vmul.f32 %v514_v18, %v513_v17 }
  0x25   :  { %571 = vmatpush3.bf16.msra.mxu0 %v613_v27  ;;  %582 = vmatprep.mubr.msk.bf16.mxu0 %vm646_vm4, %v645_v28 }
  0x26   :  { %572 = vmatprep.subr.bf16.mxu0 %v645_v28 }
  0x27   :  { %382 = vmatpush1.bf16.msra.mxu1 %v607_v21 }
  0x28   :  { %383 = vmatprep.subr.bf16.mxu1 %v644_v0 }
  0x29   :  { %573 = vmatpush3.bf16.msra.mxu0 %v614_v29 }
  0x2a   :  { %574 = vmatprep.subr.bf16.mxu0 %v645_v28 }
  0x2b   :  { %384 = vmatpush1.bf16.msra.mxu1 %v608_v22  ;;  %v522_v22 = vld [vmem:[%s811_s5] sm:$0xff] }
  0x2c   :  { %393 = vmatprep.subr.bf16.mxu1 %v644_v0 }
  0x2d   :  { %575 = vmatpush3.bf16.msra.mxu0 %v615_v30 }
  0x2e   :  { %576 = vmatprep.subr.bf16.mxu0 %v645_v28 }
  0x2f   :  { %394 = vmatpush2.bf16.msra.mxu1 %v609_v23 }
  0x30   :  { %395 = vmatprep.subr.bf16.mxu1 %v644_v0 }
  0x31   :  { %577 = vmatpush3.bf16.msra.mxu0 %v616_v31 }
  0x32   :  { %578 = vmatprep.subr.bf16.mxu0 %v645_v28 }
  0x33   :  { %396 = vmatpush2.bf16.msra.mxu1 %v610_v24 }
  0x34   :  { %397 = vmatprep.subr.bf16.mxu1 %v644_v0 }
  0x35   :  { %579 = vmatpush3.bf16.msra.mxu0 %v617_v63 }
  0x36   :  { %580 = vmatprep.subr.bf16.mxu0 %v645_v28 }
  0x37   :  { %398 = vmatpush2.bf16.msra.mxu1 %v611_v25 }
  0x38   :  { %399 = vmatprep.subr.bf16.mxu1 %v644_v0  ;;  %v618_v0 = vld [vmem:[%s818_s12] sm:$0xff]   ;;  %s647_s12 = smov 127  }
  0x39   :  { %581 = vmatpush3.bf16.msra.mxu0 %v618_v0 }
  0x3b   :  { %400 = vmatpush2.bf16.msra.mxu1 %v612_v26 }
  0xd4   :  { %v122_v32 = vpop.f32.mrf.mxu0 }
  0xd6   :  { %v124_v33 = vpop.f32.mrf.mxu0 }
  0xd8   :  { %v126_v35 = vpop.f32.mrf.mxu0 }
  0xda   :  { %v127_v36 = vpop.f32.mrf.mxu0 }
  0xdc   :  { %v177_v38 = vpop.f32.mrf.mxu0 }
  0xdd   :  { %v178_v45 = vadd.f32 %v177_v38, %v122_v32 }
  0xde   :  { %v179_v39 = vpop.f32.mrf.mxu0 }
  0xdf   :  { %v180_v48 = vadd.f32 %v179_v39, %v124_v33 }
  0xe0   :  { %v181_v41 = vpop.f32.mrf.mxu0 }
  0xe2   :  { %v182_v44 = vpop.f32.mrf.mxu0 }
  0xe4   :  { %v233_v47 = vpop.f32.mrf.mxu0 }
  0xe5   :  { %v240_v49 = vadd.f32 %v233_v47, %v178_v45 }
  0xe6   :  { %v235_v51 = vpop.f32.mrf.mxu0 }
  0xe7   :  { %v254_v52 = vadd.f32 %v247_v46, %v240_v49  ;;  %v241_v53 = vadd.f32 %v235_v51, %v180_v48 }
  0xe8   :  { %v237_v54 = vpop.f32.mrf.mxu0 }
  0xe9   :  { %v256_v55 = vmul.f32 0.01, %v254_v52  ;;  %v255_v56 = vadd.f32 %v251_v50, %v241_v53 }
  0xea   :  { %v238_v57 = vpop.f32.mrf.mxu0 }
  0xeb   :  { %v257_v58 = vmul.f32 0.01, %v255_v56  ;;  %v258_v59 = vmax.f32 %v254_v52, %v256_v55 }
  0xed   :  { %v259_v60 = vmax.f32 %v255_v56, %v257_v58  ;;  %v260_v62 = vpack.c.bf16 %v258_v59, %v258_v59 }
  0xef   :  { %v261_v61 = vpack.c.bf16 %v259_v60, %v259_v60 }
  0xf1   :  { %554 = vmatprep.mubr.msk.bf16.mxu1 %vm365_vm3, %v261_v61 }
  0xf2   :  { %402 = vmatmul.mubr.bf16.vlgmr.msra.gmra.mxu1 %v260_v62 }
 0x1b2   :  { %v403_v2 = vpop.f32.mrf.mxu1 }
 0x1b3   :  { %v404_v3 = vadd.f32 %v541_v1, %v403_v2 }
 0x1b4   :  { %v405_v4 = vpop.f32.mrf.mxu1 }
 0x1b5   :  { %v409_v5 = vmul.f32 0.01, %v404_v3 }
 0x1b6   :  { %v406_v6 = vpop.f32.mrf.mxu1 }
 0x1b7   :  { %v410_v7 = vmax.f32 %v404_v3, %v409_v5 }
 0x1b8   :  { %v407_v8 = vpop.f32.mrf.mxu1 }
 0x1b9   :  { %v411_v9 = vpack.c.bf16 %v410_v7, %v410_v7 }
 0x1bb   :  { %583 = vmatmul.mubr.msk.bf16.vlgmr.msra.gmra.mxu0 %vm467_vm5, %v411_v9 }
 0x27b   :  { %v505_v11 = vpop.f32.mrf.mxu0 }
 0x27c   :  { %v506_v12 = vadd.f32 %v555_v10, %v505_v11 }
 0x27d   :  { %v584_v13 = vpop.f32.mrf.mxu0 }
 0x27e   :  { %517 = vrot.lane.b32.xlu0 %v506_v12, %s647_s12 }
 0x27f   :  { %v508_v14 = vpop.f32.mrf.mxu0 }
 0x281   :  { %v585_v15 = vpop.f32.mrf.mxu0 }
 0x2f0   :  { %v518_v20 = vpop.permute.xlu0 %517 }
 0x2f1   :  { %v520_v21 = vmul.f32 %v518_v20, %v515_v19 }
 0x2f3   :  { %v521_v23 = vadd.f32 %v520_v21, %v506_v12 }
 0x2f5   :  { %v523_v24 = vsub.f32 %v521_v23, %v522_v22 }
 0x2f7   :  { %525 = vst.msk [vmem:[%s820_s14] sm:$0xff] %vm524_vm6, %v523_v24 }
 0x2f8   :  { %530 = vsyncpa [#allocation4], 1 }

</bundles_post_ra>
